<compile_context>
chip_gen: v5e
topology: v5e:2x2
jax: 0.10.0
libtpu: 0.0.40
codegen_flags: <defaults>
</compile_context>

<pallas_src>
import functools

import jax
import jax.numpy as jnp
from jax.experimental import pallas as pl
from jax.experimental.pallas import tpu as pltpu


def _round_up(v, m):
    return (v + m - 1) // m * m


def _patch_embed_kernel(x_ref, w_ref, b_ref, o_ref):
    # x_ref: (R, N, Kp) bf16 patch rows for R whole images
    # w_ref: (Kp, Ep) bf16 pre-transposed projection weight (NN contraction)
    # b_ref: (1, Ep)  f32 bias
    # o_ref: (R, N, Ep) out dtype
    w = w_ref[...]
    b = b_ref[...]
    for r in range(x_ref.shape[0]):        # static, small (images per step)
        acc = jnp.dot(x_ref[r], w, preferred_element_type=jnp.float32)
        o_ref[r] = (acc + b).astype(o_ref.dtype)


def _images_per_step(batch, n, kp, ep, out_bytes, target_rows, tile_budget):
    """Largest divisor of `batch` whose double-buffered tiles fit the budget."""
    per_img = 2 * n * (kp * 2 + ep * out_bytes)      # 2-deep x + out buffers
    cap_rows = max(1, target_rows // max(n, 1))
    cap_vmem = max(1, tile_budget // max(per_img, 1))
    cap = max(1, min(batch, cap_rows, cap_vmem))
    for d in range(cap, 0, -1):
        if batch % d == 0:
            return d
    return 1


def patch_embed_forward(x, weight, bias, patch_size, *, block_m=2048,
                        out_dtype=None):
    """PatchEmbed forward.

    x: (B, C, H, W) NCHW; weight: (E, C, ph, pw); bias: (E,).
    Returns (B, num_patches, E), matching `proj(x).flatten(2).transpose(1, 2)`.
    out_dtype: output dtype (default x.dtype; use jnp.bfloat16 to halve the
    output HBM writeback of this bandwidth-bound kernel).
    """
    B, C, H, W = x.shape
    E = weight.shape[0]
    ph, pw = patch_size
    assert H % ph == 0 and W % pw == 0
    gh, gw = H // ph, W // pw
    N = gh * gw                       # patches per image
    K = C * ph * pw
    out_dtype = x.dtype if out_dtype is None else out_dtype
    out_bytes = jnp.dtype(out_dtype).itemsize

    # Lane-dense padded contraction / embedding dims (multiples of 128).
    Kp = _round_up(K, 128)
    Ep = _round_up(E, 128)

    # Images per grid step: ~block_m rows per step, ~24 MiB pipelined-tile
    # budget (generation-safe), and R must divide B (no M padding, no slice).
    R = _images_per_step(B, N, Kp, Ep, out_bytes, block_m, 24 << 20)

    # --- glue: patch extraction as a single fused convert+transpose+pad ---
    # (B, C, gh, ph, gw, pw) -> (B, gh, gw, C, ph, pw) -> (B, N, K), bf16.
    xp = x.astype(jnp.bfloat16).reshape(B, C, gh, ph, gw, pw)
    xp = jnp.transpose(xp, (0, 2, 4, 1, 3, 5)).reshape(B, N, K)
    if Kp != K:
        xp = jnp.pad(xp, ((0, 0), (0, 0), (0, Kp - K)))

    # Weight transposed once to (Kp, Ep) (NN contraction in-kernel, no per-step
    # RHS relayout); bias stays f32 for the accumulate.
    w2d = jnp.pad(weight.reshape(E, K).T.astype(jnp.bfloat16),
                  ((0, Kp - K), (0, Ep - E)))
    b2d = jnp.pad(bias.astype(jnp.float32).reshape(1, E),
                  ((0, 0), (0, Ep - E)))

    # VMEM footprint: double-buffered x/out tiles + single-buffered weight/bias.
    footprint = 2 * R * N * (Kp * 2 + Ep * out_bytes) + Kp * Ep * 2 + Ep * 4
    vmem_limit = int(min(60 << 20, max(32 << 20, footprint * 5 // 4 + (4 << 20))))

    out = pl.pallas_call(
        _patch_embed_kernel,
        out_shape=jax.ShapeDtypeStruct((B, N, Ep), out_dtype),
        grid_spec=pltpu.PrefetchScalarGridSpec(
            num_scalar_prefetch=0,
            grid=(B // R,),
            in_specs=[
                # Stream R whole images of patch rows per step.
                pl.BlockSpec((R, N, Kp), lambda i: (i, 0, 0)),
                # Grid-invariant operands: VMEM-resident, single-buffered.
                pl.BlockSpec((Kp, Ep), lambda i: (0, 0),
                             pipeline_mode=pl.Buffered(1)),
                pl.BlockSpec((1, Ep), lambda i: (0, 0),
                             pipeline_mode=pl.Buffered(1)),
            ],
            out_specs=pl.BlockSpec((R, N, Ep), lambda i: (i, 0, 0)),
        ),
        compiler_params=pltpu.CompilerParams(
            # Independent image tiles -> megacore-shardable on v7x's 2 TCs.
            dimension_semantics=("parallel",),
            vmem_limit_bytes=vmem_limit,
            # Best effort: let XLA fold the patchify producer into the kernel
            # input instead of materializing it as a separate HBM pass.
            allow_input_fusion=[True, False, False],
        ),
    )(xp, w2d, b2d)

    # Already (B, N, *): only strip embedding padding (a no-op for real ViT
    # dims where E % 128 == 0, so no extra HBM pass there).
    return out if Ep == E else out[..., :E]


if __name__ == "__main__":
    # Small, module-consistent shapes: img 16x16, patch 4x4, 4 chans, dim 32.
    B, C, H, W = 2, 4, 16, 16
    ph, pw = 4, 4
    E = 32

    key = jax.random.PRNGKey(0)
    kx, kw, kb = jax.random.split(key, 3)
    x = jax.random.normal(kx, (B, C, H, W), dtype=jnp.float32)
    weight = jax.random.normal(kw, (E, C, ph, pw), dtype=jnp.float32) * 0.02
    bias = jax.random.normal(kb, (E,), dtype=jnp.float32) * 0.02

    fwd = jax.jit(functools.partial(patch_embed_forward, patch_size=(ph, pw)))
    y = fwd(x, weight, bias)
    jax.block_until_ready(y)
    assert y.shape == (B, (H // ph) * (W // pw), E)

    # f32 reference (relaxed tolerance: kernel uses bf16 operands, f32 accum).
    xr = x.reshape(B, C, H // ph, ph, W // pw, pw)
    xr = jnp.transpose(xr, (0, 2, 4, 1, 3, 5)).reshape(B, -1, C * ph * pw)
    ref = jnp.einsum("bnk,ek->bne", xr, weight.reshape(E, -1)) + bias
    assert jnp.allclose(y, ref, atol=1e-2, rtol=5e-2), "mismatch vs f32 reference"

    print("KERNEL_OK")
</pallas_src>

<mosaic_0001>
module attributes {stable_mosaic.version = 11 : i64} {
  func.func @_patch_embed_kernel(%arg0: i32, %arg1: memref<2x16x128xbf16, #tpu.memory_space<vmem>>, %arg2: memref<128x128xbf16, #tpu.memory_space<vmem>>, %arg3: memref<1x128xf32, #tpu.memory_space<vmem>>, %arg4: memref<2x16x128xf32, #tpu.memory_space<vmem>>) attributes {dimension_semantics = [#tpu.dimension_semantics<parallel>], iteration_bounds = array<i64: 1>, scalar_prefetch = 0 : i64, scratch_operands = 0 : i64, tpu.core_type = #tpu.core_type<tc>, window_params = [{transform_indices = @transform_0, window_bounds = array<i64: 2, 16, 128>}, {pipeline_mode = #tpu.pipeline_mode<synchronous>, transform_indices = @transform_1, window_bounds = array<i64: 128, 128>}, {pipeline_mode = #tpu.pipeline_mode<synchronous>, transform_indices = @transform_2, window_bounds = array<i64: 1, 128>}, {transform_indices = @transform_3, window_bounds = array<i64: 2, 16, 128>}]} {
    %c0 = arith.constant 0 : index
    %c0_0 = arith.constant 0 : index
    %0 = vector.load %arg2[%c0, %c0_0] : memref<128x128xbf16, #tpu.memory_space<vmem>>, vector<128x128xbf16>
    %c0_1 = arith.constant 0 : index
    %c0_2 = arith.constant 0 : index
    %1 = vector.load %arg3[%c0_1, %c0_2] : memref<1x128xf32, #tpu.memory_space<vmem>>, vector<1x128xf32>
    %c0_3 = arith.constant 0 : index
    %c0_4 = arith.constant 0 : index
    %c0_5 = arith.constant 0 : index
    %2 = vector.load %arg1[%c0_3, %c0_4, %c0_5] : memref<2x16x128xbf16, #tpu.memory_space<vmem>>, vector<1x16x128xbf16>
    %3 = vector.shape_cast %2 : vector<1x16x128xbf16> to vector<16x128xbf16>
    %cst = arith.constant dense<0.000000e+00> : vector<16x128xf32>
    %4 = tpu.matmul %3, %0, %cst {dimension_numbers = #tpu.dot_dimension_numbers<[1], [0], [0], [1], [0, 0, 1, 1], [], []>} : vector<16x128xbf16>, vector<128x128xbf16>, vector<16x128xf32> -> vector<16x128xf32>
    %5 = vector.broadcast %1 : vector<1x128xf32> to vector<16x128xf32>
    %6 = arith.addf %4, %5 : vector<16x128xf32>
    %c0_6 = arith.constant 0 : index
    %c0_7 = arith.constant 0 : index
    %c0_8 = arith.constant 0 : index
    %7 = vector.load %arg4[%c0_6, %c0_7, %c0_8] : memref<2x16x128xf32, #tpu.memory_space<vmem>>, vector<1x16x128xf32>
    %8 = vector.shape_cast %7 : vector<1x16x128xf32> to vector<16x128xf32>
    %9 = vector.shape_cast %6 : vector<16x128xf32> to vector<1x16x128xf32>
    tpu.vector_store %arg4[%c0_6, %c0_7, %c0_8], %9 {strides = array<i32>} : memref<2x16x128xf32, #tpu.memory_space<vmem>>, vector<1x16x128xf32>,
    %c1 = arith.constant 1 : index
    %c0_9 = arith.constant 0 : index
    %c0_10 = arith.constant 0 : index
    %10 = vector.load %arg1[%c1, %c0_9, %c0_10] : memref<2x16x128xbf16, #tpu.memory_space<vmem>>, vector<1x16x128xbf16>
    %11 = vector.shape_cast %10 : vector<1x16x128xbf16> to vector<16x128xbf16>
    %cst_11 = arith.constant dense<0.000000e+00> : vector<16x128xf32>
    %12 = tpu.matmul %11, %0, %cst_11 {dimension_numbers = #tpu.dot_dimension_numbers<[1], [0], [0], [1], [0, 0, 1, 1], [], []>} : vector<16x128xbf16>, vector<128x128xbf16>, vector<16x128xf32> -> vector<16x128xf32>
    %13 = vector.broadcast %1 : vector<1x128xf32> to vector<16x128xf32>
    %14 = arith.addf %12, %13 : vector<16x128xf32>
    %c1_12 = arith.constant 1 : index
    %c0_13 = arith.constant 0 : index
    %c0_14 = arith.constant 0 : index
    %15 = vector.load %arg4[%c1_12, %c0_13, %c0_14] : memref<2x16x128xf32, #tpu.memory_space<vmem>>, vector<1x16x128xf32>
    %16 = vector.shape_cast %15 : vector<1x16x128xf32> to vector<16x128xf32>
    %17 = vector.shape_cast %14 : vector<16x128xf32> to vector<1x16x128xf32>
    tpu.vector_store %arg4[%c1_12, %c0_13, %c0_14], %17 {strides = array<i32>} : memref<2x16x128xf32, #tpu.memory_space<vmem>>, vector<1x16x128xf32>,
    return
  }
  func.func @transform_0(%arg0: i32) -> (i32, i32, i32) {
    %c0_i32 = arith.constant 0 : i32
    %c0_i32_0 = arith.constant 0 : i32
    %c0_i32_1 = arith.constant 0 : i32
    return %arg0, %c0_i32, %c0_i32_0 : i32, i32, i32
  }
  func.func @transform_1(%arg0: i32) -> (i32, i32) {
    %c0_i32 = arith.constant 0 : i32
    %c0_i32_0 = arith.constant 0 : i32
    %c0_i32_1 = arith.constant 0 : i32
    return %c0_i32, %c0_i32_0 : i32, i32
  }
  func.func @transform_2(%arg0: i32) -> (i32, i32) {
    %c0_i32 = arith.constant 0 : i32
    %c0_i32_0 = arith.constant 0 : i32
    %c0_i32_1 = arith.constant 0 : i32
    return %c0_i32, %c0_i32_0 : i32, i32
  }
  func.func @transform_3(%arg0: i32) -> (i32, i32, i32) {
    %c0_i32 = arith.constant 0 : i32
    %c0_i32_0 = arith.constant 0 : i32
    %c0_i32_1 = arith.constant 0 : i32
    return %arg0, %c0_i32, %c0_i32_0 : i32, i32, i32
  }
}

</mosaic_0001>

<bundles_post_ra>
// kernel: patch_embed_forward.2
= control target key start
LH: loop header
LB: loop body
LE: loop exit
PB: predicated region body
PF: predicated region fallthrough
CT: control target
= control target key end

     0   :  { %s397_s0 = inlined_call_operand.vmem [shape: bf16[128,128], index: 0, kind: input, shape index: {}]   ;;  %s398_s1 = inlined_call_operand.vmem [shape: f32[1,128], index: 1, kind: input, shape index: {}]   ;;  %s399_s2 = inlined_call_operand.vmem [shape: bf16[2,16,64], index: 2, kind: input, shape index: {}]   ;;  %s400_s3 = inlined_call_operand.<no memory space> [shape: bf16[], index: 3, kind: input, shape index: {}]   ;;  %s401_s4 = inlined_call_operand.hbm [shape: f32[2,16,128], index: 4, kind: output, shape index: {}]  }
   0x1   :  { %v9_v0 = vstv %s400_s3 }
   0x2   :  { %v10_v1 = vunpack.i.l.bf16 %v9_v0 }
   0x3   :  { %v297_v2 = vld [vmem:[%s397_s0 + $0x38] sm:$0xff]  ;;  %v33_v3 = vlaneseq  ;;  %v296_v4 = vld [vmem:[%s397_s0 + $0x30] sm:$0xff]  ;;  %v30_v5 = vld [vmem:[%s399_s2] sm:$0xff]  }
   0x4   :  { %187 = vmatpush.bf16.msra.mxu0 %v297_v2  ;;  %212 = vmatpush.bf16.msra.mxu1 %v297_v2  ;;  %v31_v7 = vunpack.c.l.bf16 %v30_v5  ;;  %v53_v8 = vunpack.c.h.bf16 %v30_v5  ;;  %v248_v9 = vld [vmem:[%s399_s2 + $0x8] sm:$0xff]  }
   0x5   :  { %v34_v6 = vand.u32 127, %v33_v3  ;;  %v76_v10 = vunpack.c.l.bf16 %v248_v9  ;;  %v99_v11 = vunpack.c.h.bf16 %v248_v9 }
   0x7   :  { %vm36_vm0 = vcmp.lt.s32.totalorder %v34_v6, 64 }
   0x8   :  { %14 = vsyncpa [#allocation8], 0  ;;  %v37_v12 = vsel %vm36_vm0, %v31_v7, %v10_v1  ;;  %v59_v13 = vsel %vm36_vm0, %v53_v8, %v10_v1  ;;  %188 = vmatpush.bf16.msra.mxu0 %v296_v4  ;;  %213 = vmatpush.bf16.msra.mxu1 %v296_v4  ;;  %v295_v14 = vld [vmem:[%s397_s0 + $0x28] sm:$0xff]  ;;  %v82_v17 = vsel %vm36_vm0, %v76_v10, %v10_v1  ;;  %v294_v21 = vld [vmem:[%s397_s0 + $0x20] sm:$0xff]  ;;  %s330_s11 = smov [#allocation7]   ;;  %s235_s14 = sshll.u32 %s401_s4, 4  ;;  %s236_s14 = int_to_ptr.hbm [resolvable:$true] %s235_s14 }
   0x9   :  { %v38_v15 = vpack.c.bf16 0.0, %v37_v12  ;;  %v61_v16 = vpack.c.bf16 0.0, %v59_v13  ;;  %v105_v18 = vsel %vm36_vm0, %v99_v11, %v10_v1  ;;  %v84_v19 = vpack.c.bf16 0.0, %v82_v17  ;;  %v293_v22 = vld [vmem:[%s397_s0 + $0x18] sm:$0xff]  ;;  %v292_v23 = vld [vmem:[%s397_s0 + $0x10] sm:$0xff]  ;;  %v291_v24 = vld [vmem:[%s397_s0 + $0x8] sm:$0xff] }
   0xa   :  { %v107_v20 = vpack.c.bf16 0.0, %v105_v18  ;;  %v290_v25 = vld [vmem:[%s397_s0] sm:$0xff]  ;;  %s233_s12 = sshll.u32 %s330_s11, 4  ;;  %s332_s15 = smov 8   ;;  %s234_s12 = int_to_ptr.vmem [resolvable:$true] %s233_s12 }
   0xb   :  { %41 = vst [vmem:[#allocation9] sm:$0xf] %v38_v15  ;;  %v303_v28 = vld [vmem:[%s398_s1] ss:$0 sm:$0xff]  ;;  %s331_s1 = smov 128  }
   0xc   :  { %64 = vst [vmem:[#allocation9 + $0x4] sm:$0xf] %v61_v16  ;;  %189 = vmatpush.bf16.msra.mxu0 %v295_v14  ;;  %214 = vmatpush.bf16.msra.mxu1 %v295_v14 }
   0xd   :  { %87 = vst [vmem:[#allocation9 + $0x8] sm:$0xf] %v84_v19 }
   0xe   :  { %110 = vst [vmem:[#allocation9 + $0xc] sm:$0xf] %v107_v20 }
  0x10   :  { %190 = vmatpush.bf16.msra.mxu0 %v294_v21  ;;  %215 = vmatpush.bf16.msra.mxu1 %v294_v21 }
  0x13   :  { %v298_v26 = vld [vmem:[#allocation9] sm:$0xff] }
  0x14   :  { %191 = vmatpush.bf16.msra.mxu0 %v293_v22  ;;  %216 = vmatpush.bf16.msra.mxu1 %v293_v22 }
  0x15   :  { %v299_v27 = vld [vmem:[#allocation9 + $0x8] sm:$0xff] }
  0x18   :  { %192 = vmatpush.bf16.msra.mxu0 %v292_v23  ;;  %217 = vmatpush.bf16.msra.mxu1 %v292_v23 }
  0x1c   :  { %193 = vmatpush.bf16.msra.mxu0 %v291_v24  ;;  %218 = vmatpush.bf16.msra.mxu1 %v291_v24 }
  0x20   :  { %194 = vmatpush.bf16.msra.mxu0 %v290_v25  ;;  %219 = vmatpush.bf16.msra.mxu1 %v290_v25 }
  0x23   :  { %195 = vmatmul.bf16.vlgmr.msra.gmra.mxu0 %v298_v26  ;;  %220 = vmatmul.bf16.vlgmr.msra.gmra.mxu1 %v299_v27 }
  0xa0   :  { %v196_v29 = vpop.f32.mrf.mxu0  ;;  %v221_v30 = vpop.f32.mrf.mxu1 }
  0xa1   :  { %v197_v31 = vadd.f32 %v303_v28, %v196_v29  ;;  %v222_v32 = vadd.f32 %v303_v28, %v221_v30 }
  0xa3   :  { %201 = vst [vmem:[#allocation7] sm:$0xff] %v197_v31 }
  0xa4   :  { %227 = vst [vmem:[#allocation7 + $0x10] sm:$0xff] %v222_v32 }
  0xa8   :  { %v198_v33 = vpop.f32.mrf.mxu0  ;;  %v223_v34 = vpop.f32.mrf.mxu1 }
  0xa9   :  { %v199_v35 = vadd.f32 %v303_v28, %v198_v33  ;;  %v224_v36 = vadd.f32 %v303_v28, %v223_v34 }
  0xab   :  { %202 = vst [vmem:[#allocation7 + $0x8] sm:$0xff] %v199_v35 }
  0xac   :  { %228 = vst [vmem:[#allocation7 + $0x18] sm:$0xff] %v224_v36 }
  0xad   :  { %241 = dma.vmem_to_hbm [thread:$0]  %s234_s12, 512, %s236_s14, [#allocation8], %s331_s1, %s331_s1, %s332_s15  }
  0xae   :  { %328 = dma.done.wait [#allocation8], 512  }
  0xaf   :  { %329 = vsyncadd [#allocation8], 4294966784 }
  0xb0   :  { %246 = vsyncpa [#allocation8], 1 }

</bundles_post_ra>
